<compile_context>
chip_gen: v7x
topology: tpu7x:2x2x1
jax: 0.10.0
libtpu: 0.0.40
codegen_flags: <defaults>
</compile_context>

<pallas_src>
import functools

import jax
import jax.numpy as jnp
from jax.experimental import pallas as pl
from jax.experimental.pallas import tpu as pltpu


def _label_smoothing_kernel(x_ref, t_ref, sum_ref, cnt_ref, acc_sum, acc_cnt, *,
                            n_tokens, row_tile, num_labels, smoothing,
                            ignore_index):
    c = pl.program_id(0)                    # split ("parallel" on v7x)
    i = pl.program_id(1)                    # inner reduction axis
    tiles_per_split = pl.num_programs(1)

    @pl.when(i == 0)
    def _():
        acc_sum[...] = jnp.zeros_like(acc_sum)
        acc_cnt[...] = jnp.zeros_like(acc_cnt)

    logits = x_ref[...].astype(jnp.float32)   # (C, TN)  classes on sublanes
    tgt = t_ref[...]                          # (1, TN)  int32

    # Numerically stable log-sum-exp along the class (sublane) axis.
    m = jnp.max(logits, axis=0, keepdims=True)                   # (1, TN)
    z = logits - m                                               # (C, TN)
    lse = jnp.log(jnp.sum(jnp.exp(z), axis=0, keepdims=True))    # (1, TN)

    # Smoothed-label weights sum to 1, so
    #   loss = -sum_c w_c*(z_c - lse) = lse - sum_c w_c*z_c
    conf = 1.0 - smoothing
    off = smoothing / (num_labels - 1)
    cls = jax.lax.broadcasted_iota(jnp.int32, z.shape, 0)        # (C, TN)
    w = jnp.where(cls == tgt, conf, off)                         # (C, TN)
    per_tok = lse - jnp.sum(w * z, axis=0, keepdims=True)        # (1, TN)

    # Ragged-tail masking (no HBM padding) + ignore_index masking.
    base = (c * tiles_per_split + i) * row_tile
    lane = jax.lax.broadcasted_iota(jnp.int32, tgt.shape, 1)     # (1, TN)
    valid = ((base + lane) < n_tokens) & (tgt != ignore_index)   # (1, TN)

    # Per-lane accumulation only; cross-lane reduce deferred to the last step.
    acc_sum[...] += jnp.where(valid, per_tok, 0.0)
    acc_cnt[...] += valid.astype(jnp.float32)

    @pl.when(i == tiles_per_split - 1)
    def _():
        sum_ref[...] = jnp.sum(acc_sum[...]).reshape(1, 1, 1)
        cnt_ref[...] = jnp.sum(acc_cnt[...]).reshape(1, 1, 1)


def _device_kind():
    try:
        return jax.devices()[0].device_kind.lower()
    except Exception:  # pragma: no cover - CPU emulation / exotic backends
        return ""


def _choose_row_tile(n, num_labels, x_itemsize, n_split, vmem_budget_bytes,
                     cap=32768):
    """Pick a lane-axis (token) tile: multiple of 128, sized from a VMEM budget.

    Accounts for dtype-dependent sublane packing of the input tile, the
    double-buffered int32 targets, the f32 temporaries materialized per step
    (z, exp(z), weights, products) and the per-lane accumulator scratch.
    """
    pack = max(1, 4 // max(1, x_itemsize))                    # rows per 32-bit sublane
    c_pad_in = -(-num_labels // (8 * pack)) * (8 * pack)      # input sublane pad
    c_pad_f32 = -(-num_labels // 8) * 8                       # f32 temp sublane pad
    bytes_per_tok = (2 * c_pad_in * x_itemsize                # 2x-buffered logits tile
                     + 2 * 8 * 4                              # 2x-buffered int32 targets
                     + 4 * c_pad_f32 * 4                      # in-kernel f32 temporaries
                     + 2 * 4)                                 # per-lane f32 accumulators
    tile = vmem_budget_bytes // max(bytes_per_tok, 1)
    tile = min(tile, cap)
    rows_per_split = -(-n // n_split)
    tile = min(tile, -(-rows_per_split // 128) * 128)         # no bigger than needed
    tile = max(128, (tile // 128) * 128)
    return int(tile)


def label_smoothing_loss(logits, targets, *, num_labels, smoothing=0.1,
                         ignore_index=-100, classes_first=False,
                         row_tile=None, n_split=None,
                         vmem_budget_bytes=None, vmem_limit_bytes=None):
    """Pallas implementation of LabelSmoothingLoss.forward.

    logits: (..., num_labels) by default, or (num_labels, ...) when
      classes_first=True (preferred - lets the producer emit the classifier
      head class-major so this wrapper does zero extra HBM passes).
    The HBM stream keeps the caller's dtype (bf16 stays bf16); math is f32.
    """
    kind = _device_kind()
    is_v7 = "v7" in kind
    if n_split is None:
        n_split = 2 if is_v7 else 1                      # 2 TensorCores only on v7x
    if vmem_budget_bytes is None:
        vmem_budget_bytes = (16 << 20) if is_v7 else (24 << 20)
    if vmem_limit_bytes is None:
        vmem_limit_bytes = (48 << 20) if is_v7 else (64 << 20)

    if classes_first:
        x_cn = logits.reshape(num_labels, -1)            # already (C, N): no extra pass
    else:
        # One extra HBM pass (transpose to the lane-dense (C, N) layout).
        # TODO(synk): producers should emit the head as (C, N) and use classes_first.
        x_cn = logits.reshape(-1, num_labels).T
    t = targets.reshape(1, -1).astype(jnp.int32)
    n = x_cn.shape[1]

    if row_tile is None:
        row_tile = _choose_row_tile(n, num_labels,
                                    jnp.dtype(x_cn.dtype).itemsize,
                                    n_split, vmem_budget_bytes)
    row_tile = max(128, (int(row_tile) // 128) * 128)    # lane-axis alignment

    rows_per_split = -(-n // n_split)
    tiles_per_split = max(1, -(-rows_per_split // row_tile))
    total_blocks = max(1, -(-n // row_tile))
    last_block = total_blocks - 1

    if n_split * tiles_per_split > total_blocks:
        # Some (split, tile) pairs would start past the end of the data: clamp
        # their block index onto the last real block (the kernel masks them to
        # zero via the token-index check) so no DMA window is fully OOB and no
        # HBM padding copy is ever made.
        def tok_block(c, i):
            return jnp.minimum(c * tiles_per_split + i, last_block)
    else:
        def tok_block(c, i):
            return c * tiles_per_split + i

    kernel = functools.partial(
        _label_smoothing_kernel,
        n_tokens=n, row_tile=row_tile, num_labels=num_labels,
        smoothing=smoothing, ignore_index=ignore_index)

    dims = ("parallel", "arbitrary") if n_split > 1 else ("arbitrary", "arbitrary")

    sum_part, cnt_part = pl.pallas_call(
        kernel,
        out_shape=(jax.ShapeDtypeStruct((n_split, 1, 1), jnp.float32),
                   jax.ShapeDtypeStruct((n_split, 1, 1), jnp.float32)),
        grid_spec=pltpu.PrefetchScalarGridSpec(
            num_scalar_prefetch=0,
            grid=(n_split, tiles_per_split),
            in_specs=[
                pl.BlockSpec((num_labels, row_tile),
                             lambda c, i: (0, tok_block(c, i))),
                pl.BlockSpec((1, row_tile),
                             lambda c, i: (0, tok_block(c, i))),
            ],
            out_specs=(pl.BlockSpec((1, 1, 1), lambda c, i: (c, 0, 0)),
                       pl.BlockSpec((1, 1, 1), lambda c, i: (c, 0, 0))),
            scratch_shapes=[pltpu.VMEM((1, row_tile), jnp.float32),
                            pltpu.VMEM((1, row_tile), jnp.float32)]),
        compiler_params=pltpu.CompilerParams(
            dimension_semantics=dims,
            vmem_limit_bytes=vmem_limit_bytes),
    )(x_cn, t)

    s = jnp.sum(sum_part)
    c = jnp.sum(cnt_part)
    # Matches PyTorch: returns 0.0 when there are no valid tokens.
    # Note: count accumulates in f32 -> exact below ~2^24 valid tokens/call.
    return jnp.where(c > 0, s / jnp.maximum(c, 1.0), jnp.float32(0.0))


def _reference(logits, targets, *, num_labels, smoothing=0.1, ignore_index=-100):
    """Pure-JAX reference mirroring the PyTorch module."""
    x = logits.reshape(-1, num_labels).astype(jnp.float32)
    t = targets.reshape(-1)
    valid = t != ignore_index
    logp = jax.nn.log_softmax(x, axis=-1)
    conf = 1.0 - smoothing
    off = smoothing / (num_labels - 1)
    col = jnp.arange(num_labels)[None, :]
    smooth = jnp.where(col == jnp.where(valid, t, 0)[:, None], conf, off)
    per_row = -jnp.sum(smooth * logp, axis=-1)
    s = jnp.sum(jnp.where(valid, per_row, 0.0))
    c = jnp.sum(valid.astype(jnp.float32))
    return jnp.where(c > 0, s / jnp.maximum(c, 1.0), 0.0)


if __name__ == "__main__":
    # --- Check 1: small NER-like setup (batch=2, seq=8, num_labels=9), ragged
    #     tail masking (n=16 < 128-lane tile), ignore_index tokens. ---
    batch, seq, num_labels = 2, 8, 9
    smoothing, ignore_index = 0.1, -100

    key = jax.random.PRNGKey(0)
    k_logits, k_tgt = jax.random.split(key)
    logits = jax.random.normal(k_logits, (batch, seq, num_labels), jnp.float32)
    targets = jax.random.randint(k_tgt, (batch, seq), 0, num_labels, jnp.int32)
    targets = targets.at[0, 0].set(ignore_index)
    targets = targets.at[1, 5].set(ignore_index)
    targets = targets.at[1, 7].set(ignore_index)

    loss = label_smoothing_loss(
        logits, targets,
        num_labels=num_labels, smoothing=smoothing, ignore_index=ignore_index)
    loss = jax.block_until_ready(loss)
    ref = _reference(
        logits, targets,
        num_labels=num_labels, smoothing=smoothing, ignore_index=ignore_index)
    assert jnp.allclose(loss, ref, rtol=1e-5, atol=1e-5), (loss, ref)

    # --- Check 2: multiple row tiles per split + bf16 HBM stream. ---
    b2, s2 = 4, 160
    k1, k2 = jax.random.split(jax.random.PRNGKey(1))
    logits2 = jax.random.normal(k1, (b2, s2, num_labels), jnp.float32)
    logits2_bf16 = logits2.astype(jnp.bfloat16)
    targets2 = jax.random.randint(k2, (b2, s2), 0, num_labels, jnp.int32)
    targets2 = targets2.at[:, :3].set(ignore_index)

    loss2 = label_smoothing_loss(
        logits2_bf16, targets2,
        num_labels=num_labels, smoothing=smoothing, ignore_index=ignore_index,
        row_tile=128)
    loss2 = jax.block_until_ready(loss2)
    ref2 = _reference(
        logits2_bf16.astype(jnp.float32), targets2,
        num_labels=num_labels, smoothing=smoothing, ignore_index=ignore_index)
    assert jnp.allclose(loss2, ref2, rtol=1e-3, atol=1e-3), (loss2, ref2)

    # --- Check 3: classes_first (no wrapper transpose) + forced n_split=2,
    #     which exercises the clamped index_map (phantom tile contributes 0). ---
    logits2_cf = jnp.moveaxis(logits2, -1, 0)            # (num_labels, b2, s2)
    loss3 = label_smoothing_loss(
        logits2_cf, targets2,
        num_labels=num_labels, smoothing=smoothing, ignore_index=ignore_index,
        classes_first=True, row_tile=128, n_split=2)
    loss3 = jax.block_until_ready(loss3)
    ref3 = _reference(
        logits2, targets2,
        num_labels=num_labels, smoothing=smoothing, ignore_index=ignore_index)
    assert jnp.allclose(loss3, ref3, rtol=1e-5, atol=1e-5), (loss3, ref3)

    print("KERNEL_OK")
</pallas_src>

<mosaic_0001>
module attributes {stable_mosaic.version = 11 : i64} {
  func.func @_label_smoothing_kernel(%arg0: i32, %arg1: i32, %arg2: memref<9x128xf32, #tpu.memory_space<vmem>>, %arg3: memref<1x128xi32, #tpu.memory_space<vmem>>, %arg4: memref<1x1x1xf32, #tpu.memory_space<vmem>>, %arg5: memref<1x1x1xf32, #tpu.memory_space<vmem>>, %arg6: memref<1x128xf32, #tpu.memory_space<vmem>>, %arg7: memref<1x128xf32, #tpu.memory_space<vmem>>) attributes {dimension_semantics = [#tpu.dimension_semantics<arbitrary>, #tpu.dimension_semantics<arbitrary>], iteration_bounds = array<i64: 1, 1>, scalar_prefetch = 0 : i64, scratch_operands = 2 : i64, tpu.core_type = #tpu.core_type<tc>, window_params = [{transform_indices = @transform_0, window_bounds = array<i64: 9, 128>}, {transform_indices = @transform_1, window_bounds = array<i64: 1, 128>}, {transform_indices = @transform_2, window_bounds = array<i64: 1, 1, 1>}, {transform_indices = @transform_3, window_bounds = array<i64: 1, 1, 1>}]} {
    %c0_i32 = arith.constant 0 : i32
    %0 = arith.cmpi eq, %arg1, %c0_i32 : i32
    %1 = arith.extui %0 : i1 to i32
    %c0_i32_0 = arith.constant 0 : i32
    %2 = arith.cmpi ne, %1, %c0_i32_0 : i32
    scf.if %2 {
      %cst_19 = arith.constant 0.000000e+00 : f32
      %47 = vector.broadcast %cst_19 : f32 to vector<1x128xf32>
      %c0_20 = arith.constant 0 : index
      %c0_21 = arith.constant 0 : index
      %48 = vector.load %arg6[%c0_20, %c0_21] : memref<1x128xf32, #tpu.memory_space<vmem>>, vector<1x128xf32>
      tpu.vector_store %arg6[%c0_20, %c0_21], %47 {strides = array<i32>} : memref<1x128xf32, #tpu.memory_space<vmem>>, vector<1x128xf32>,
      %cst_22 = arith.constant 0.000000e+00 : f32
      %49 = vector.broadcast %cst_22 : f32 to vector<1x128xf32>
      %c0_23 = arith.constant 0 : index
      %c0_24 = arith.constant 0 : index
      %50 = vector.load %arg7[%c0_23, %c0_24] : memref<1x128xf32, #tpu.memory_space<vmem>>, vector<1x128xf32>
      tpu.vector_store %arg7[%c0_23, %c0_24], %49 {strides = array<i32>} : memref<1x128xf32, #tpu.memory_space<vmem>>, vector<1x128xf32>,
    } else {
    }
    %c0 = arith.constant 0 : index
    %c0_1 = arith.constant 0 : index
    %3 = vector.load %arg2[%c0, %c0_1] : memref<9x128xf32, #tpu.memory_space<vmem>>, vector<9x128xf32>
    %c0_2 = arith.constant 0 : index
    %c0_3 = arith.constant 0 : index
    %4 = vector.load %arg3[%c0_2, %c0_3] : memref<1x128xi32, #tpu.memory_space<vmem>>, vector<1x128xi32>
    %cst = arith.constant dense<0xFF800000> : vector<128xf32>
    %5 = vector.multi_reduction <maximumf>, %3, %cst [0] : vector<9x128xf32> to vector<128xf32>
    %6 = vector.shape_cast %5 : vector<128xf32> to vector<1x128xf32>
    %7 = vector.broadcast %6 : vector<1x128xf32> to vector<9x128xf32>
    %8 = arith.subf %3, %7 : vector<9x128xf32>
    %9 = math.exp %8 : vector<9x128xf32>
    %cst_4 = arith.constant dense<0.000000e+00> : vector<128xf32>
    %10 = vector.multi_reduction <add>, %9, %cst_4 [0] : vector<9x128xf32> to vector<128xf32>
    %11 = vector.shape_cast %10 : vector<128xf32> to vector<1x128xf32>
    %12 = math.log %11 : vector<1x128xf32>
    %13 = tpu.iota {dimensions = array<i32: 0>} : vector<9x128xi32>
    %14 = vector.broadcast %4 : vector<1x128xi32> to vector<9x128xi32>
    %15 = arith.cmpi eq, %13, %14 : vector<9x128xi32>
    %cst_5 = arith.constant 0.899999976 : f32
    %cst_6 = arith.constant 1.250000e-02 : f32
    %16 = vector.broadcast %cst_5 : f32 to vector<9x128xf32>
    %17 = vector.broadcast %cst_6 : f32 to vector<9x128xf32>
    %18 = arith.select %15, %16, %17 : vector<9x128xi1>, vector<9x128xf32>
    %19 = arith.mulf %18, %8 : vector<9x128xf32>
    %cst_7 = arith.constant dense<0.000000e+00> : vector<128xf32>
    %20 = vector.multi_reduction <add>, %19, %cst_7 [0] : vector<9x128xf32> to vector<128xf32>
    %21 = vector.shape_cast %20 : vector<128xf32> to vector<1x128xf32>
    %22 = arith.subf %12, %21 : vector<1x128xf32>
    %c1_i32 = arith.constant 1 : i32
    %23 = arith.muli %arg0, %c1_i32 : i32
    %24 = arith.addi %23, %arg1 : i32
    %c128_i32 = arith.constant 128 : i32
    %25 = arith.muli %24, %c128_i32 : i32
    %26 = tpu.iota {dimensions = array<i32: 1>} : vector<1x128xi32>
    %27 = vector.broadcast %25 : i32 to vector<1x128xi32>
    %28 = arith.addi %27, %26 : vector<1x128xi32>
    %c16_i32 = arith.constant 16 : i32
    %29 = vector.broadcast %c16_i32 : i32 to vector<1x128xi32>
    %30 = arith.cmpi slt, %28, %29 : vector<1x128xi32>
    %c-100_i32 = arith.constant -100 : i32
    %31 = vector.broadcast %c-100_i32 : i32 to vector<1x128xi32>
    %32 = arith.cmpi ne, %4, %31 : vector<1x128xi32>
    %33 = arith.andi %30, %32 : vector<1x128xi1>
    %c0_8 = arith.constant 0 : index
    %c0_9 = arith.constant 0 : index
    %34 = vector.load %arg6[%c0_8, %c0_9] : memref<1x128xf32, #tpu.memory_space<vmem>>, vector<1x128xf32>
    %cst_10 = arith.constant 0.000000e+00 : f32
    %35 = vector.broadcast %cst_10 : f32 to vector<1x128xf32>
    %36 = arith.select %33, %22, %35 : vector<1x128xi1>, vector<1x128xf32>
    %37 = arith.addf %34, %36 : vector<1x128xf32>
    %c0_11 = arith.constant 0 : index
    %c0_12 = arith.constant 0 : index
    %38 = vector.load %arg6[%c0_11, %c0_12] : memref<1x128xf32, #tpu.memory_space<vmem>>, vector<1x128xf32>
    tpu.vector_store %arg6[%c0_11, %c0_12], %37 {strides = array<i32>} : memref<1x128xf32, #tpu.memory_space<vmem>>, vector<1x128xf32>,
    %c0_13 = arith.constant 0 : index
    %c0_14 = arith.constant 0 : index
    %39 = vector.load %arg7[%c0_13, %c0_14] : memref<1x128xf32, #tpu.memory_space<vmem>>, vector<1x128xf32>
    %40 = arith.extui %33 : vector<1x128xi1> to vector<1x128xi32>
    %41 = arith.sitofp %40 : vector<1x128xi32> to vector<1x128xf32>
    %42 = arith.addf %39, %41 : vector<1x128xf32>
    %c0_15 = arith.constant 0 : index
    %c0_16 = arith.constant 0 : index
    %43 = vector.load %arg7[%c0_15, %c0_16] : memref<1x128xf32, #tpu.memory_space<vmem>>, vector<1x128xf32>
    tpu.vector_store %arg7[%c0_15, %c0_16], %42 {strides = array<i32>} : memref<1x128xf32, #tpu.memory_space<vmem>>, vector<1x128xf32>,
    %c0_i32_17 = arith.constant 0 : i32
    %44 = arith.cmpi eq, %arg1, %c0_i32_17 : i32
    %45 = arith.extui %44 : i1 to i32
    %c0_i32_18 = arith.constant 0 : i32
    %46 = arith.cmpi ne, %45, %c0_i32_18 : i32
    scf.if %46 {
      %c0_19 = arith.constant 0 : index
      %c0_20 = arith.constant 0 : index
      %47 = vector.load %arg6[%c0_19, %c0_20] : memref<1x128xf32, #tpu.memory_space<vmem>>, vector<1x128xf32>
      %48 = vector.shape_cast %47 : vector<1x128xf32> to vector<1x1x128xf32>
      %cst_21 = arith.constant dense<0.000000e+00> : vector<1xf32>
      %49 = vector.multi_reduction <add>, %48, %cst_21 [1, 2] : vector<1x1x128xf32> to vector<1xf32>
      %50 = vector.shape_cast %49 : vector<1xf32> to vector<1x1x1xf32>
      %51 = vector.extract %50[0, 0, 0] : f32 from vector<1x1x1xf32>
      %52 = vector.broadcast %51 : f32 to vector<1x1x1xf32>
      %c0_22 = arith.constant 0 : index
      %c0_23 = arith.constant 0 : index
      %c0_24 = arith.constant 0 : index
      %53 = vector.load %arg4[%c0_22, %c0_23, %c0_24] : memref<1x1x1xf32, #tpu.memory_space<vmem>>, vector<1x1x1xf32>
      tpu.vector_store %arg4[%c0_22, %c0_23, %c0_24], %52 {strides = array<i32>} : memref<1x1x1xf32, #tpu.memory_space<vmem>>, vector<1x1x1xf32>,
      %c0_25 = arith.constant 0 : index
      %c0_26 = arith.constant 0 : index
      %54 = vector.load %arg7[%c0_25, %c0_26] : memref<1x128xf32, #tpu.memory_space<vmem>>, vector<1x128xf32>
      %55 = vector.shape_cast %54 : vector<1x128xf32> to vector<1x1x128xf32>
      %cst_27 = arith.constant dense<0.000000e+00> : vector<1xf32>
      %56 = vector.multi_reduction <add>, %55, %cst_27 [1, 2] : vector<1x1x128xf32> to vector<1xf32>
      %57 = vector.shape_cast %56 : vector<1xf32> to vector<1x1x1xf32>
      %58 = vector.extract %57[0, 0, 0] : f32 from vector<1x1x1xf32>
      %59 = vector.broadcast %58 : f32 to vector<1x1x1xf32>
      %c0_28 = arith.constant 0 : index
      %c0_29 = arith.constant 0 : index
      %c0_30 = arith.constant 0 : index
      %60 = vector.load %arg5[%c0_28, %c0_29, %c0_30] : memref<1x1x1xf32, #tpu.memory_space<vmem>>, vector<1x1x1xf32>
      tpu.vector_store %arg5[%c0_28, %c0_29, %c0_30], %59 {strides = array<i32>} : memref<1x1x1xf32, #tpu.memory_space<vmem>>, vector<1x1x1xf32>,
    } else {
    }
    return
  }
  func.func @transform_0(%arg0: i32, %arg1: i32) -> (i32, i32) {
    %c1_i32 = arith.constant 1 : i32
    %0 = arith.muli %arg0, %c1_i32 : i32
    %1 = arith.addi %0, %arg1 : i32
    %c0_i32 = arith.constant 0 : i32
    %c0_i32_0 = arith.constant 0 : i32
    return %c0_i32, %1 : i32, i32
  }
  func.func @transform_1(%arg0: i32, %arg1: i32) -> (i32, i32) {
    %c1_i32 = arith.constant 1 : i32
    %0 = arith.muli %arg0, %c1_i32 : i32
    %1 = arith.addi %0, %arg1 : i32
    %c0_i32 = arith.constant 0 : i32
    %c0_i32_0 = arith.constant 0 : i32
    return %c0_i32, %1 : i32, i32
  }
  func.func @transform_2(%arg0: i32, %arg1: i32) -> (i32, i32, i32) {
    %c0_i32 = arith.constant 0 : i32
    %c0_i32_0 = arith.constant 0 : i32
    %c0_i32_1 = arith.constant 0 : i32
    return %arg0, %c0_i32, %c0_i32_0 : i32, i32, i32
  }
  func.func @transform_3(%arg0: i32, %arg1: i32) -> (i32, i32, i32) {
    %c0_i32 = arith.constant 0 : i32
    %c0_i32_0 = arith.constant 0 : i32
    %c0_i32_1 = arith.constant 0 : i32
    return %arg0, %c0_i32, %c0_i32_0 : i32, i32, i32
  }
}

</mosaic_0001>

<bundles_post_ra>
// kernel: tpu_custom_call.1
= control target key start
LH: loop header
LB: loop body
LE: loop exit
PB: predicated region body
PF: predicated region fallthrough
CT: control target
= control target key end

     0   :  { %9 = vsyncpa [#allocation5], 0  ;;  %s389_s0 = inlined_call_operand.hbm [shape: f32[9,16], index: 0, kind: input, shape index: {}]   ;;  %s390_s1 = inlined_call_operand.hbm [shape: s32[1,16], index: 1, kind: input, shape index: {}]   ;;  %s391_s2 = inlined_call_operand.hbm [shape: f32[1,1,1], index: 2, kind: output, shape index: {0}]   ;;  %s392_s3 = inlined_call_operand.hbm [shape: f32[1,1,1], index: 3, kind: output, shape index: {1}]  }
   0x1   :  { %10 = vsyncpa [#allocation8], 0 }
   0x2   :  { %11 = vsyncpa [#allocation6], 0 }
   0x3   :  { %12 = vsyncpa [#allocation11], 0  ;;  %s298_s12 = smov [#allocation4]   ;;  %s202_s16 = scalar_lea.hbm %s389_s0, 256 }
   0x4   :  { %s21_s13 = sshll.u32 %s298_s12, 4  ;;  %p203_p0 = scmp.ne.s32.totalorder %s389_s0, %s202_s16  ;;  %s22_s13 = int_to_ptr.vmem [resolvable:$true] %s21_s13 }
   0x5   :  { %p206_p1 = scmp.lt.u32.totalorder %s202_s16, %s389_s0 }
   0x7   :  { %p208_p2 = pnand %p206_p1, %p203_p0 }
   0x9   :  { %211 = shalt.err (!%p208_p2)
}
   0xa   :  { %s212_s21 = scalar_lea.vmem %s22_s13, 256  ;;  %p217_p4 = scmp.lt.s32.totalorder %s22_s13, %s22_s13 }
   0xb   :  { %p213_p3 = scmp.ne.s32.totalorder %s22_s13, %s212_s21  ;;  %p218_p5 = scmp.lt.s32.totalorder %s212_s21, %s212_s21 }
   0xd   :  { %p219_p6 = por %p218_p5, %p217_p4 }
   0xf   :  { %p220_p7 = pnand %p219_p6, %p213_p3 }
  0x11   :  { %223 = shalt.err (!%p220_p7)
}
  0x12   :  { %s299_s22 = smov 128   ;;  %s300_s23 = smov 8  }
  0x13   :  { %27 = dma.hbm_to_vmem [thread:$0]  %s389_s0, 256, %s22_s13, [#allocation5], %s299_s22, %s299_s22, %s300_s23  }
  0x14   :  { %s301_s26 = smov [#allocation7]   ;;  %s224_s30 = scalar_lea.hbm %s390_s1, 16 }
  0x15   :  { %s37_s27 = sshll.u32 %s301_s26, 4  ;;  %p225_p8 = scmp.ne.s32.totalorder %s390_s1, %s224_s30  ;;  %s38_s27 = int_to_ptr.vmem [resolvable:$true] %s37_s27 }
  0x16   :  { %p228_p9 = scmp.lt.u32.totalorder %s224_s30, %s390_s1 }
  0x18   :  { %p230_p10 = pnand %p228_p9, %p225_p8 }
  0x1a   :  { %233 = shalt.err (!%p230_p10)
}
  0x1b   :  { %s234_s8 = scalar_lea.vmem %s38_s27, 16  ;;  %s238_s0 = scalar_lea.vmem %s38_s27, 32 }
  0x1c   :  { %p235_p11 = scmp.ne.s32.totalorder %s38_s27, %s234_s8  ;;  %p239_p12 = scmp.lt.s32.totalorder %s38_s27, %s38_s27 }
  0x1d   :  { %p240_p13 = scmp.lt.s32.totalorder %s238_s0, %s234_s8 }
  0x1f   :  { %p241_p0 = por %p240_p13, %p239_p12 }
  0x21   :  { %p242_p1 = pnand %p241_p0, %p235_p11 }
  0x23   :  { %245 = shalt.err (!%p242_p1)
}
  0x24   :  { %40 = dma.hbm_to_vmem [thread:$0]  %s390_s1, 16, %s38_s27, [#allocation8]  }
  0x25   :  { %290 = dma.done.wait [#allocation5], 256  }
  0x26   :  { %291 = vsyncadd [#allocation5], 4294967040 }
  0x27   :  { %292 = dma.done.wait [#allocation8], 16  }
  0x28   :  { %293 = vsyncadd [#allocation8], 4294967280  ;;  %v83_v0 = vlaneseq  ;;  %v302_v1 = vmov 0.0   ;;  %vm58_vm0 = vcmask 1040384   ;;  %v55_v3 = vld [vmem:[#allocation4] sm:$0xff]  ;;  %s304_s1 = smov [#allocation9]  }
  0x29   :  { %53 = vst [vmem:[#allocation2] sm:$0x1] %v302_v1  ;;  %54 = vst [vmem:[#allocation3] sm:$0x1] %v302_v1  ;;  %v56_v4 = vld [vmem:[#allocation4 + $0x8] sm:$0x1] }
  0x2a   :  { %v108_v2 = vand.u32 127, %v83_v0  ;;  %v57_v5 = vld [vmem:[#allocation7] sm:$0x1]  ;;  %v59_v6 = vsel %vm58_vm0, %v56_v4, -inf  ;;  %v84_v14 = vshrl.u32 %v83_v0, 7  ;;  %s159_s11 = sshll.u32 %s304_s1, 4  ;;  %s160_s11 = int_to_ptr.vmem [resolvable:$true] %s159_s11 }
  0x2b   :  { %vm112_vm2 = vcmp.ne.s32.totalorder %v57_v5, 4294967196  ;;  %v60_v8 = vmax.f32 %v55_v3, %v59_v6  ;;  %v303_v26 = vmov 0.0125   ;;  %vm138_vm6 = vcmask 0   ;;  %s305_s13 = smov [#allocation10]   ;;  %s246_s15 = scalar_lea.vmem %s160_s11, 16 }
  0x2c   :  { %vm111_vm1 = vcmp.lt.s32.totalorder %v108_v2, 16  ;;  %v88_v17 = vsub.s32 0, %v84_v14  ;;  %v85_v20 = vadd.s32 8, %v84_v14  ;;  %s169_s14 = sshll.u32 %s305_s13, 4  ;;  %p247_p2 = scmp.ne.s32.totalorder %s160_s11, %s246_s15  ;;  %s170_s14 = int_to_ptr.vmem [resolvable:$true] %s169_s14 }
  0x2d   :  { %vm351_vm3 = vmand %vm111_vm1, %vm112_vm2  ;;  %v61_v11 = vrot.slane %v60_v8, 4  ;;  %s250_s16 = scalar_lea.vmem %s160_s11, 32  ;;  %p251_p3 = scmp.lt.s32.totalorder %s160_s11, %s160_s11 }
  0x2e   :  { %v183_v10 = vsel %vm351_vm3, 1.0, %v302_v1  ;;  %v89_v21 = vrot.slane %v57_v5, %v88_v17  ;;  %p252_p4 = scmp.lt.s32.totalorder %s250_s16, %s246_s15 }
  0x2f   :  { %v62_v13 = vmax.f32 %v60_v8, %v61_v11 }
  0x30   :  { %v118_v7 = vld [vmem:[#allocation3] sm:$0x1]  ;;  %vm91_vm4 = vcmp.eq.s32.totalorder %v85_v20, %v89_v21  ;;  %vm90_vm5 = vcmp.eq.s32.totalorder %v84_v14, %v89_v21  ;;  %v114_v52 = vld [vmem:[#allocation2] sm:$0x1]  ;;  %p253_p5 = por %p252_p4, %p251_p3 }
  0x31   :  { %v121_v12 = vadd.f32 %v183_v10, %v118_v7  ;;  %v63_v15 = vrot.slane %v62_v13, 2  ;;  %v93_v27 = vsel %vm91_vm4, 0.9, %v303_v26  ;;  %v92_v28 = vsel %vm90_vm5, 0.9, %v303_v26 }
  0x32   :  { %p254_p6 = pnand %p253_p5, %p247_p2 }
  0x33   :  { %122 = vst [vmem:[#allocation3] sm:$0x1] %v121_v12  ;;  %v64_v16 = vmax.f32 %v62_v13, %v63_v15 }
  0x35   :  { %v65_v18 = vrot.slane %v64_v16, 1 }
  0x37   :  { %v66_v19 = vmax.f32 %v64_v16, %v65_v18 }
  0x39   :  { %v67_v22 = vsub.f32 %v55_v3, %v66_v19  ;;  %v68_v23 = vsub.f32 %v56_v4, %v66_v19 }
  0x3a   :  { %v140_v56 = vld [vmem:[#allocation3] sm:$0x1] }
  0x3b   :  { %v69_v24 = vmul.f32 1.442695, %v67_v22  ;;  %v71_v25 = vmul.f32 1.442695, %v68_v23  ;;  %v95_v29 = vmul.f32 %v93_v27, %v68_v23  ;;  %v94_v30 = vmul.f32 %v92_v28, %v67_v22 }
  0x3c   :  { %v141_v58 = vsel %vm58_vm0, %v140_v56, 0.0 }
  0x3d   :  { %196 = vpow2.f32 %v69_v24  ;;  %v96_v31 = vsel %vm58_vm0, %v95_v29, 0.0 }
  0x3e   :  { %198 = vpow2.f32 %v71_v25  ;;  %v97_v35 = vadd.f32 %v96_v31, %v94_v30 }
  0x40   :  { %v98_v38 = vrot.slane %v97_v35, 4 }
  0x42   :  { %v99_v41 = vadd.f32 %v98_v38, %v97_v35 }
  0x44   :  { %v100_v44 = vrot.slane %v99_v41, 2 }
  0x46   :  { %v101_v46 = vadd.f32 %v100_v44, %v99_v41 }
  0x47   :  { %v197_v32 = vpop.eup %196 }
  0x48   :  { %v199_v33 = vpop.eup %198  ;;  %v102_v47 = vrot.slane %v101_v46, 1 }
  0x49   :  { %v73_v34 = vsel %vm58_vm0, %v199_v33, 0.0 }
  0x4a   :  { %v74_v36 = vadd.f32 %v197_v32, %v73_v34  ;;  %v103_v48 = vadd.f32 %v102_v47, %v101_v46 }
  0x4c   :  { %v75_v37 = vrot.slane %v74_v36, 4 }
  0x4e   :  { %v76_v39 = vadd.f32 %v75_v37, %v74_v36 }
  0x50   :  { %v77_v40 = vrot.slane %v76_v39, 2 }
  0x52   :  { %v78_v42 = vadd.f32 %v77_v40, %v76_v39 }
  0x54   :  { %v79_v43 = vrot.slane %v78_v42, 1 }
  0x56   :  { %v80_v45 = vadd.f32 %v79_v43, %v78_v42 }
  0x58   :  { %200 = vlog2.f32 %v80_v45 }
  0x62   :  { %v201_v49 = vpop.eup %200 }
  0x63   :  { %v82_v50 = vmul.f32 0.6931472, %v201_v49 }
  0x65   :  { %v104_v51 = vsub.f32 %v82_v50, %v103_v48 }
  0x67   :  { %v115_v53 = vsel %vm351_vm3, %v104_v51, 0.0 }
  0x68   :  { %v116_v54 = vadd.f32 %v115_v53, %v114_v52 }
  0x6a   :  { %117 = vst [vmem:[#allocation2] sm:$0x1] %v116_v54 }
  0x71   :  { %v126_v55 = vld [vmem:[#allocation2] sm:$0x1] }
  0x72   :  { %v127_v57 = vsel %vm58_vm0, %v126_v55, 0.0 }
  0x73   :  { %128 = vadd.xlane.f32.xlu0 %v127_v57 }
  0x77   :  { %142 = vadd.xlane.f32.xlu0 %v141_v58 }
 0x100   :  { %v129_v59 = vpop.xlane.xlu0 %128 }
 0x101   :  { %v130_v60 = vrot.slane %v129_v59, 4 }
 0x103   :  { %v131_v61 = vadd.f32 %v130_v60, %v129_v59 }
 0x104   :  { %v143_v62 = vpop.xlane.xlu0 %142 }
 0x105   :  { %v132_v63 = vrot.slane %v131_v61, 2  ;;  %v144_v0 = vrot.slane %v143_v62, 4 }
 0x107   :  { %v145_v1 = vadd.f32 %v144_v0, %v143_v62  ;;  %v133_v2 = vadd.f32 %v132_v63, %v131_v61 }
 0x109   :  { %v146_v3 = vrot.slane %v145_v1, 2  ;;  %v134_v4 = vrot.slane %v133_v2, 1 }
 0x10b   :  { %v147_v5 = vadd.f32 %v146_v3, %v145_v1  ;;  %v135_v6 = vadd.f32 %v134_v4, %v133_v2 }
 0x10d   :  { %184 = vpush %v135_v6  ;;  %v148_v7 = vrot.slane %v147_v5, 1 }
 0x10f   :  { %v149_v8 = vadd.f32 %v148_v7, %v147_v5 }
 0x111   :  { %186 = vpush %v149_v8 }
 0x13e   :  { %s185_s12 = spop %184 }
 0x13f   :  { %v137_v9 = vstv %s185_s12 }
 0x140   :  { %139 = vst.msk [vmem:[#allocation9] sm:$0x1] %vm138_vm6, %v137_v9 }
 0x141   :  { %257 = shalt.err (!%p254_p6)
}
 0x142   :  { %s258_s19 = scalar_lea.hbm %s391_s2, 16 }
 0x143   :  { %p259_p7 = scmp.ne.s32.totalorder %s391_s2, %s258_s19  ;;  %p262_p8 = scmp.lt.u32.totalorder %s258_s19, %s391_s2 }
 0x145   :  { %p264_p9 = pnand %p262_p8, %p259_p7 }
 0x147   :  { %267 = shalt.err (!%p264_p9)
}
 0x148   :  { %162 = dma.vmem_to_hbm [thread:$0]  %s160_s11, 16, %s391_s2, [#allocation6]  }
 0x149   :  { %s187_s26 = spop %186  ;;  %s268_s27 = scalar_lea.vmem %s170_s14, 16 }
 0x14a   :  { %v151_v10 = vstv %s187_s26  ;;  %p269_p10 = scmp.ne.s32.totalorder %s170_s14, %s268_s27  ;;  %s272_s28 = scalar_lea.vmem %s170_s14, 32 }
 0x14b   :  { %152 = vst.msk [vmem:[#allocation10] sm:$0x1] %vm138_vm6, %v151_v10  ;;  %p273_p11 = scmp.lt.s32.totalorder %s170_s14, %s170_s14  ;;  %p274_p12 = scmp.lt.s32.totalorder %s272_s28, %s268_s27 }
 0x14d   :  { %p275_p13 = por %p274_p12, %p273_p11 }
 0x14f   :  { %p276_p0 = pnand %p275_p13, %p269_p10 }
 0x151   :  { %279 = shalt.err (!%p276_p0)
}
 0x152   :  { %s280_s4 = scalar_lea.hbm %s392_s3, 16 }
 0x153   :  { %p281_p1 = scmp.ne.s32.totalorder %s392_s3, %s280_s4  ;;  %p284_p2 = scmp.lt.u32.totalorder %s280_s4, %s392_s3 }
 0x155   :  { %p286_p3 = pnand %p284_p2, %p281_p1 }
 0x157   :  { %289 = shalt.err (!%p286_p3)
}
 0x158   :  { %172 = dma.vmem_to_hbm [thread:$0]  %s170_s14, 16, %s392_s3, [#allocation11]  }
 0x159   :  { %294 = dma.done.wait [#allocation6], 16  }
 0x15a   :  { %295 = vsyncadd [#allocation6], 4294967280 }
 0x15b   :  { %296 = dma.done.wait [#allocation11], 16  }
 0x15c   :  { %297 = vsyncadd [#allocation11], 4294967280 }
 0x15d   :  { %179 = vsyncpa [#allocation5], 1 }
 0x15e   :  { %180 = vsyncpa [#allocation8], 1 }
 0x15f   :  { %181 = vsyncpa [#allocation6], 1 }
 0x160   :  { %182 = vsyncpa [#allocation11], 1 }

</bundles_post_ra>
